<compile_context>
chip_gen: v7x
topology: tpu7x:2x2x1
jax: 0.10.0
libtpu: 0.0.40
codegen_flags: <defaults>
</compile_context>

<pallas_src>
import functools

import jax
import jax.numpy as jnp
from jax.experimental import pallas as pl
from jax.experimental.pallas import tpu as pltpu


def _round_up(x, m):
    return (x + m - 1) // m * m


def _pick_tile(dim, candidates):
    """Largest candidate tile that evenly divides `dim`."""
    for c in candidates:
        if dim % c == 0:
            return c
    return candidates[-1]


# ---------------------------------------------------------------------------
# Pallas kernel: out = act((X @ W) * scale + bias)      (fused conv+BN+ReLU)
# Grid = (M tiles, N tiles, K tiles); K innermost ("arbitrary"), M/N "parallel".
# ---------------------------------------------------------------------------
def _matmul_bn_act_kernel(x_ref, w_ref, s_ref, b_ref, o_ref, acc_ref, *, apply_relu):
    @pl.when(pl.program_id(2) == 0)
    def _():
        acc_ref[...] = jnp.zeros_like(acc_ref)

    acc_ref[...] += jnp.dot(x_ref[...], w_ref[...],
                            preferred_element_type=jnp.float32)

    @pl.when(pl.program_id(2) == pl.num_programs(2) - 1)
    def _():
        y = acc_ref[...] * s_ref[...] + b_ref[...]
        if apply_relu:
            y = jnp.maximum(y, 0.0)
        o_ref[...] = y.astype(o_ref.dtype)


def matmul_bn_act(x, w, scale, bias, apply_relu=True, out_dtype=jnp.float32):
    """x: (M, K), w: (K, N), scale/bias: (N,) -> (M, N) in `out_dtype`.

    MXU runs in bf16 with an f32 accumulator; scale/bias/ReLU applied in f32.
    Padding/slicing only happens when shapes are not already aligned.
    """
    M, K = x.shape
    Kw, N = w.shape
    assert K == Kw

    Mp = _round_up(M, 8)
    Kp = _round_up(K, 128)   # pad K only to the lane width, not to tk
    Np = _round_up(N, 128)

    xb = x.astype(jnp.bfloat16)
    wb = w.astype(jnp.bfloat16)
    if (Mp, Kp) != (M, K):
        xb = jnp.pad(xb, ((0, Mp - M), (0, Kp - K)))
    if (Kp, Np) != (K, N):
        wb = jnp.pad(wb, ((0, Kp - K), (0, Np - N)))

    s = scale.astype(jnp.float32)
    b = bias.astype(jnp.float32)
    if Np != N:
        s = jnp.pad(s, (0, Np - N))
        b = jnp.pad(b, (0, Np - N))
    s = s.reshape(1, Np)
    b = b.reshape(1, Np)

    # MXU-friendly, VMEM-bounded tiles (exact divisors of the padded dims).
    tm = _pick_tile(Mp, (512, 256, 128, 64, 32, 16, 8))
    tn = _pick_tile(Np, (512, 256, 128))
    tk = _pick_tile(Kp, (512, 384, 256, 128))

    grid = (Mp // tm, Np // tn, Kp // tk)
    kernel = functools.partial(_matmul_bn_act_kernel, apply_relu=apply_relu)

    out = pl.pallas_call(
        kernel,
        out_shape=jax.ShapeDtypeStruct((Mp, Np), out_dtype),
        grid=grid,
        in_specs=[
            pl.BlockSpec((tm, tk), lambda i, j, k: (i, k)),
            pl.BlockSpec((tk, tn), lambda i, j, k: (k, j)),
            pl.BlockSpec((1, tn), lambda i, j, k: (0, j)),
            pl.BlockSpec((1, tn), lambda i, j, k: (0, j)),
        ],
        out_specs=pl.BlockSpec((tm, tn), lambda i, j, k: (i, j)),
        scratch_shapes=[pltpu.VMEM((tm, tn), jnp.float32)],
        compiler_params=pltpu.CompilerParams(
            dimension_semantics=("parallel", "parallel", "arbitrary"),
        ),
    )(xb, wb, s, b)

    if (Mp, Np) != (M, N):
        out = out[:M, :N]
    return out


# ---------------------------------------------------------------------------
# Conv / deconv wrappers (plain-JAX im2col glue around the Pallas matmul)
# ---------------------------------------------------------------------------
# TODO(synk): the 3x3-tap im2col gather is still done in plain JAX (9x activation
# bytes in HBM); folding the shifted-tap accumulation into the kernel grid is the
# next step if the stride-1 128/256-channel layers become HBM-bound.
def conv3x3_bn_act(x, w, scale, bias, stride, apply_relu=True,
                   out_dtype=jnp.float32):
    """x: (N,H,W,Cin) NHWC, w: (3,3,Cin,Cout). 3x3 conv, padding=1."""
    n, h, wd, cin = x.shape
    cout = w.shape[-1]
    ho = (h + 2 - 3) // stride + 1
    wo = (wd + 2 - 3) // stride + 1
    xb = x.astype(jnp.bfloat16)                 # gather in bf16: halves im2col bytes
    xp = jnp.pad(xb, ((0, 0), (1, 1), (1, 1), (0, 0)))
    cols = []
    for ky in range(3):
        for kx in range(3):
            cols.append(xp[:, ky:ky + stride * (ho - 1) + 1:stride,
                           kx:kx + stride * (wo - 1) + 1:stride, :])
    cols = jnp.concatenate(cols, axis=-1).reshape(n * ho * wo, 9 * cin)
    w2 = w.reshape(9 * cin, cout)
    out = matmul_bn_act(cols, w2, scale, bias, apply_relu, out_dtype=out_dtype)
    return out.reshape(n, ho, wo, cout)


def deconv_upsample_bn_relu(x, w_t, scale, bias, k, out_dtype=jnp.float32):
    """ConvTranspose2d with kernel=stride=k, padding=0.
    x: (N,H,W,Cin), w_t: torch layout (Cin, Cout, k, k)."""
    n, h, wd, cin = x.shape
    cout = w_t.shape[1]
    w2 = jnp.transpose(w_t, (0, 2, 3, 1)).reshape(cin, k * k * cout)
    s2 = jnp.tile(scale, k * k)
    b2 = jnp.tile(bias, k * k)
    out = matmul_bn_act(x.reshape(n * h * wd, cin), w2, s2, b2,
                        apply_relu=True, out_dtype=out_dtype)
    out = out.reshape(n, h, wd, k, k, cout)
    # TODO(synk): pixel-shuffle transpose kept in XLA; could be folded into the
    # kernel's out BlockSpec for a lane-dense scatter (saves ~2 HBM passes).
    out = jnp.transpose(out, (0, 1, 3, 2, 4, 5)).reshape(n, h * k, wd * k, cout)
    return out


def deconv3x3_s1_bn_relu(x, w_t, scale, bias, out_dtype=jnp.float32):
    """ConvTranspose2d(k=3, s=1, p=1) == conv3x3(p=1) with flipped/transposed W."""
    w_conv = jnp.transpose(jnp.flip(w_t, axis=(2, 3)), (2, 3, 0, 1))  # (3,3,Cin,Cout)
    return conv3x3_bn_act(x, w_conv, scale, bias, stride=1, apply_relu=True,
                          out_dtype=out_dtype)


# ---------------------------------------------------------------------------
# Deterministic parameter init (shapes follow the module's __init__)
# ---------------------------------------------------------------------------
def _init_conv(key, cin, cout, k=3):
    kw, kb = jax.random.split(key)
    w = jax.random.normal(kw, (k, k, cin, cout), jnp.float32) * jnp.sqrt(2.0 / (k * k * cin))
    b = 0.01 * jax.random.normal(kb, (cout,), jnp.float32)
    return w, b


def _init_deconv(key, cin, cout, k):
    kw, kb = jax.random.split(key)
    w = jax.random.normal(kw, (cin, cout, k, k), jnp.float32) * jnp.sqrt(2.0 / (cin * k * k))
    b = 0.01 * jax.random.normal(kb, (cout,), jnp.float32)
    return w, b


def _init_bn(key, c, eps=1e-5):
    k1, k2, k3, k4 = jax.random.split(key, 4)
    gamma = 1.0 + 0.1 * jax.random.normal(k1, (c,), jnp.float32)
    beta = 0.1 * jax.random.normal(k2, (c,), jnp.float32)
    mean = 0.1 * jax.random.normal(k3, (c,), jnp.float32)
    var = 1.0 + 0.1 * jax.random.uniform(k4, (c,), jnp.float32)
    scale = gamma / jnp.sqrt(var + eps)
    shift = beta - mean * scale
    return scale, shift


def init_rpn_params(key, in_channels, num_anchors_per_cell):
    params = {"blocks": [], "deconvs": []}
    block_defs = [
        [(in_channels, 128, 2)] + [(128, 128, 1)] * 3,
        [(128, 128, 2)] + [(128, 128, 1)] * 5,
        # TODO(synk): original conv1_block3 call is a TypeError (duplicate c_in) and
        # is paired with BN(128) despite 256 output channels; using the intended
        # 128->256 stride-2 conv with BN(256).
        [(128, 256, 2)] + [(256, 256, 1)] * 5,
    ]
    for bdef in block_defs:
        layers = []
        for (cin, cout, stride) in bdef:
            key, k1, k2 = jax.random.split(key, 3)
            w, b = _init_conv(k1, cin, cout)
            s, sh = _init_bn(k2, cout)
            layers.append((w, b, s, sh, stride))
        params["blocks"].append(layers)

    # TODO(synk): original deconvs declare in_channels=256 (mismatching the 128-ch
    # block1/2 outputs), deconv_2 is defined twice and deconv_3 is missing, and
    # RPN.deconv() calls getattr on the tensor; implementing the intended
    # VoxelNet-style deconv tower (s1/k3, s2/k2, s4/k4 -> 256 channels each).
    deconv_defs = [(128, 256, 3, "s1"), (128, 256, 2, 2), (256, 256, 4, 4)]
    for (cin, cout, k, kind) in deconv_defs:
        key, k1, k2 = jax.random.split(key, 3)
        w, b = _init_deconv(k1, cin, cout, k)
        s, sh = _init_bn(k2, cout)
        params["deconvs"].append((w, b, s, sh, kind))

    key, k1, k2 = jax.random.split(key, 3)
    # Faithful to the reference: _conv_layer ignores its kernel_size/padding args,
    # so the prob/reg heads are 3x3 pad=1 convs over the 768-channel concat.
    params["prob_head"] = _init_conv(k1, 256 * 3, num_anchors_per_cell)
    params["reg_head"] = _init_conv(k2, 256 * 3, 7 * num_anchors_per_cell)
    return params


# ---------------------------------------------------------------------------
# Forward pass (mirrors RPN.forward)
# ---------------------------------------------------------------------------
def rpn_forward(params, x_nchw):
    x = jnp.transpose(x_nchw, (0, 2, 3, 1)).astype(jnp.bfloat16)  # NCHW -> NHWC
    deconv_outs = []
    for bi in range(3):
        for (w, b, s, sh, stride) in params["blocks"][bi]:
            bias_eff = s * b + sh           # fold conv bias into BN affine
            x = conv3x3_bn_act(x, w, s, bias_eff, stride, apply_relu=True,
                               out_dtype=jnp.bfloat16)
        dw, db, ds, dsh, kind = params["deconvs"][bi]
        dbias_eff = ds * db + dsh
        if kind == "s1":
            d = deconv3x3_s1_bn_relu(x, dw, ds, dbias_eff, out_dtype=jnp.bfloat16)
        else:
            d = deconv_upsample_bn_relu(x, dw, ds, dbias_eff, k=kind,
                                        out_dtype=jnp.bfloat16)
        deconv_outs.append(d)

    cat = jnp.concatenate(deconv_outs, axis=-1)  # (N, H/2, W/2, 768) bf16

    # Fused prob+reg heads: one matmul over the shared im2col, split afterwards.
    pw, pb = params["prob_head"]
    rw, rb = params["reg_head"]
    a = pw.shape[-1]
    hw = jnp.concatenate([pw, rw], axis=-1)           # (3,3,768, A + 7A)
    hb = jnp.concatenate([pb, rb], axis=0)
    ones = jnp.ones((hw.shape[-1],), jnp.float32)
    heads = conv3x3_bn_act(cat, hw, ones, hb, stride=1, apply_relu=False,
                           out_dtype=jnp.float32)
    prob = heads[..., :a]
    reg = heads[..., a:]
    # back to NCHW to match the PyTorch reference
    return jnp.transpose(prob, (0, 3, 1, 2)), jnp.transpose(reg, (0, 3, 1, 2))


if __name__ == "__main__":
    key = jax.random.PRNGKey(0)
    kp, kx = jax.random.split(key)
    in_channels, num_anchors = 4, 2
    params = init_rpn_params(kp, in_channels, num_anchors)

    x = jax.random.normal(kx, (2, in_channels, 16, 16), jnp.float32)  # NCHW
    prob_map, reg_map = rpn_forward(params, x)
    jax.block_until_ready((prob_map, reg_map))

    assert prob_map.shape == (2, num_anchors, 8, 8), prob_map.shape
    assert reg_map.shape == (2, 7 * num_anchors, 8, 8), reg_map.shape
    assert jnp.all(jnp.isfinite(prob_map)) and jnp.all(jnp.isfinite(reg_map))
    print("KERNEL_OK")
</pallas_src>

<mosaic_0001>
module attributes {stable_mosaic.version = 11 : i64} {
  func.func @_matmul_bn_act_kernel(%arg0: i32, %arg1: i32, %arg2: i32, %arg3: memref<128x128xbf16, #tpu.memory_space<vmem>>, %arg4: memref<128x128xbf16, #tpu.memory_space<vmem>>, %arg5: memref<1x128xf32, #tpu.memory_space<vmem>>, %arg6: memref<1x128xf32, #tpu.memory_space<vmem>>, %arg7: memref<128x128xbf16, #tpu.memory_space<vmem>>, %arg8: memref<128x128xf32, #tpu.memory_space<vmem>>) attributes {dimension_semantics = [#tpu.dimension_semantics<parallel>, #tpu.dimension_semantics<parallel>, #tpu.dimension_semantics<arbitrary>], iteration_bounds = array<i64: 1, 1, 1>, scalar_prefetch = 0 : i64, scratch_operands = 1 : i64, tpu.core_type = #tpu.core_type<tc>, window_params = [{transform_indices = @transform_0, window_bounds = array<i64: 128, 128>}, {transform_indices = @transform_1, window_bounds = array<i64: 128, 128>}, {transform_indices = @transform_2, window_bounds = array<i64: 1, 128>}, {transform_indices = @transform_3, window_bounds = array<i64: 1, 128>}, {transform_indices = @transform_4, window_bounds = array<i64: 128, 128>}]} {
    %c0_i32 = arith.constant 0 : i32
    %0 = arith.cmpi eq, %arg2, %c0_i32 : i32
    %1 = arith.extui %0 : i1 to i32
    %c0_i32_0 = arith.constant 0 : i32
    %2 = arith.cmpi ne, %1, %c0_i32_0 : i32
    scf.if %2 {
      %cst_10 = arith.constant 0.000000e+00 : f32
      %12 = vector.broadcast %cst_10 : f32 to vector<128x128xf32>
      %c0_11 = arith.constant 0 : index
      %c0_12 = arith.constant 0 : index
      %13 = vector.load %arg8[%c0_11, %c0_12] : memref<128x128xf32, #tpu.memory_space<vmem>>, vector<128x128xf32>
      tpu.vector_store %arg8[%c0_11, %c0_12], %12 {strides = array<i32>} : memref<128x128xf32, #tpu.memory_space<vmem>>, vector<128x128xf32>,
    } else {
    }
    %c0 = arith.constant 0 : index
    %c0_1 = arith.constant 0 : index
    %3 = vector.load %arg8[%c0, %c0_1] : memref<128x128xf32, #tpu.memory_space<vmem>>, vector<128x128xf32>
    %c0_2 = arith.constant 0 : index
    %c0_3 = arith.constant 0 : index
    %4 = vector.load %arg3[%c0_2, %c0_3] : memref<128x128xbf16, #tpu.memory_space<vmem>>, vector<128x128xbf16>
    %c0_4 = arith.constant 0 : index
    %c0_5 = arith.constant 0 : index
    %5 = vector.load %arg4[%c0_4, %c0_5] : memref<128x128xbf16, #tpu.memory_space<vmem>>, vector<128x128xbf16>
    %cst = arith.constant dense<0.000000e+00> : vector<128x128xf32>
    %6 = tpu.matmul %4, %5, %cst {dimension_numbers = #tpu.dot_dimension_numbers<[1], [0], [0], [1], [0, 0, 1, 1], [], []>} : vector<128x128xbf16>, vector<128x128xbf16>, vector<128x128xf32> -> vector<128x128xf32>
    %7 = arith.addf %3, %6 : vector<128x128xf32>
    %c0_6 = arith.constant 0 : index
    %c0_7 = arith.constant 0 : index
    %8 = vector.load %arg8[%c0_6, %c0_7] : memref<128x128xf32, #tpu.memory_space<vmem>>, vector<128x128xf32>
    tpu.vector_store %arg8[%c0_6, %c0_7], %7 {strides = array<i32>} : memref<128x128xf32, #tpu.memory_space<vmem>>, vector<128x128xf32>,
    %c0_i32_8 = arith.constant 0 : i32
    %9 = arith.cmpi eq, %arg2, %c0_i32_8 : i32
    %10 = arith.extui %9 : i1 to i32
    %c0_i32_9 = arith.constant 0 : i32
    %11 = arith.cmpi ne, %10, %c0_i32_9 : i32
    scf.if %11 {
      %c0_10 = arith.constant 0 : index
      %c0_11 = arith.constant 0 : index
      %12 = vector.load %arg8[%c0_10, %c0_11] : memref<128x128xf32, #tpu.memory_space<vmem>>, vector<128x128xf32>
      %c0_12 = arith.constant 0 : index
      %c0_13 = arith.constant 0 : index
      %13 = vector.load %arg5[%c0_12, %c0_13] : memref<1x128xf32, #tpu.memory_space<vmem>>, vector<1x128xf32>
      %14 = vector.broadcast %13 : vector<1x128xf32> to vector<128x128xf32>
      %15 = arith.mulf %12, %14 : vector<128x128xf32>
      %c0_14 = arith.constant 0 : index
      %c0_15 = arith.constant 0 : index
      %16 = vector.load %arg6[%c0_14, %c0_15] : memref<1x128xf32, #tpu.memory_space<vmem>>, vector<1x128xf32>
      %17 = vector.broadcast %16 : vector<1x128xf32> to vector<128x128xf32>
      %18 = arith.addf %15, %17 : vector<128x128xf32>
      %cst_16 = arith.constant 0.000000e+00 : f32
      %19 = vector.broadcast %cst_16 : f32 to vector<128x128xf32>
      %20 = arith.maximumf %18, %19 : vector<128x128xf32>
      %21 = arith.truncf %20 : vector<128x128xf32> to vector<128x128xbf16>
      %c0_17 = arith.constant 0 : index
      %c0_18 = arith.constant 0 : index
      %22 = vector.load %arg7[%c0_17, %c0_18] : memref<128x128xbf16, #tpu.memory_space<vmem>>, vector<128x128xbf16>
      tpu.vector_store %arg7[%c0_17, %c0_18], %21 {strides = array<i32>} : memref<128x128xbf16, #tpu.memory_space<vmem>>, vector<128x128xbf16>,
    } else {
    }
    return
  }
  func.func @transform_0(%arg0: i32, %arg1: i32, %arg2: i32) -> (i32, i32) {
    %c0_i32 = arith.constant 0 : i32
    return %arg0, %arg2 : i32, i32
  }
  func.func @transform_1(%arg0: i32, %arg1: i32, %arg2: i32) -> (i32, i32) {
    %c0_i32 = arith.constant 0 : i32
    return %arg2, %arg1 : i32, i32
  }
  func.func @transform_2(%arg0: i32, %arg1: i32, %arg2: i32) -> (i32, i32) {
    %c0_i32 = arith.constant 0 : i32
    %c0_i32_0 = arith.constant 0 : i32
    return %c0_i32, %arg1 : i32, i32
  }
  func.func @transform_3(%arg0: i32, %arg1: i32, %arg2: i32) -> (i32, i32) {
    %c0_i32 = arith.constant 0 : i32
    %c0_i32_0 = arith.constant 0 : i32
    return %c0_i32, %arg1 : i32, i32
  }
  func.func @transform_4(%arg0: i32, %arg1: i32, %arg2: i32) -> (i32, i32) {
    %c0_i32 = arith.constant 0 : i32
    return %arg0, %arg1 : i32, i32
  }
}

</mosaic_0001>

<bundles_post_ra>
// kernel: tpu_custom_call.1
= control target key start
LH: loop header
LB: loop body
LE: loop exit
PB: predicated region body
PF: predicated region fallthrough
CT: control target
= control target key end

     0   :  { %9 = vsyncpa [#allocation4], 0  ;;  %s872_s0 = inlined_call_operand.hbm [shape: bf16[128,128], index: 0, kind: input, shape index: {}]   ;;  %s873_s1 = inlined_call_operand.hbm [shape: bf16[128,128], index: 1, kind: input, shape index: {}]   ;;  %s874_s2 = inlined_call_operand.vmem [shape: f32[1,128], index: 2, kind: input, shape index: {}]   ;;  %s875_s3 = inlined_call_operand.vmem [shape: f32[1,128], index: 3, kind: input, shape index: {}]   ;;  %s876_s4 = inlined_call_operand.hbm [shape: bf16[128,128], index: 4, kind: output, shape index: {}]  }
   0x1   :  { %10 = vsyncpa [#allocation7], 0 }
   0x2   :  { %11 = vsyncpa [#allocation5], 0  ;;  %s773_s15 = smov [#allocation3]   ;;  %s701_s19 = scalar_lea.hbm %s872_s0, 1024 }
   0x3   :  { %s17_s16 = sshll.u32 %s773_s15, 4  ;;  %p702_p0 = scmp.ne.s32.totalorder %s872_s0, %s701_s19  ;;  %s18_s16 = int_to_ptr.vmem [resolvable:$true] %s17_s16 }
   0x4   :  { %p705_p1 = scmp.lt.u32.totalorder %s701_s19, %s872_s0 }
   0x6   :  { %p707_p2 = pnand %p705_p1, %p702_p0 }
   0x8   :  { %710 = shalt.err (!%p707_p2)
}
   0x9   :  { %s711_s24 = scalar_lea.vmem %s18_s16, 1024  ;;  %p716_p4 = scmp.lt.s32.totalorder %s18_s16, %s18_s16 }
   0xa   :  { %p712_p3 = scmp.ne.s32.totalorder %s18_s16, %s711_s24  ;;  %p717_p5 = scmp.lt.s32.totalorder %s711_s24, %s711_s24 }
   0xc   :  { %p718_p6 = por %p717_p5, %p716_p4 }
   0xe   :  { %p719_p7 = pnand %p718_p6, %p712_p3 }
  0x10   :  { %722 = shalt.err (!%p719_p7)
}
  0x11   :  { %s774_s25 = smov 64   ;;  %s775_s26 = smov 4  }
  0x12   :  { %23 = dma.hbm_to_vmem [thread:$0]  %s872_s0, 1024, %s18_s16, [#allocation4], %s774_s25, %s774_s25, %s775_s26  }
  0x13   :  { %s776_s29 = smov [#allocation6]   ;;  %s723_s7 = scalar_lea.hbm %s873_s1, 1024 }
  0x14   :  { %s29_s30 = sshll.u32 %s776_s29, 4  ;;  %p724_p8 = scmp.ne.s32.totalorder %s873_s1, %s723_s7  ;;  %s30_s30 = int_to_ptr.vmem [resolvable:$true] %s29_s30 }
  0x15   :  { %p727_p9 = scmp.lt.u32.totalorder %s723_s7, %s873_s1 }
  0x17   :  { %p729_p10 = pnand %p727_p9, %p724_p8 }
  0x19   :  { %732 = shalt.err (!%p729_p10)
}
  0x1a   :  { %s733_s12 = scalar_lea.vmem %s30_s30, 1024  ;;  %p738_p12 = scmp.lt.s32.totalorder %s30_s30, %s30_s30 }
  0x1b   :  { %p734_p11 = scmp.ne.s32.totalorder %s30_s30, %s733_s12  ;;  %p739_p13 = scmp.lt.s32.totalorder %s733_s12, %s733_s12 }
  0x1d   :  { %p740_p0 = por %p739_p13, %p738_p12 }
  0x1f   :  { %p741_p1 = pnand %p740_p0, %p734_p11 }
  0x21   :  { %744 = shalt.err (!%p741_p1)
}
  0x22   :  { %35 = dma.hbm_to_vmem [thread:$0]  %s873_s1, 1024, %s30_s30, [#allocation7], %s774_s25, %s774_s25, %s775_s26  }
  0x23   :  { %767 = dma.done.wait [#allocation4], 1024  }
  0x24   :  { %768 = vsyncadd [#allocation4], 4294966272 }
  0x25   :  { %769 = dma.done.wait [#allocation7], 1024  }
  0x26   :  { %770 = vsyncadd [#allocation7], 4294966272  ;;  %v685_v0 = vld [vmem:[#allocation6] sm:$0xff]   ;;  %v686_v1 = vld [vmem:[#allocation6 + $0x8] sm:$0xff]  }
  0x27   :  { %632 = vmatprep.subr.bf16.mxu0 %v685_v0  ;;  %664 = vmatprep.subr.bf16.mxu1 %v685_v0  ;;  %v687_v2 = vld [vmem:[#allocation6 + $0x10] sm:$0xff]   ;;  %v688_v3 = vld [vmem:[#allocation6 + $0x18] sm:$0xff]   ;;  %v693_v4 = vld [vmem:[#allocation3] sm:$0xff]  }
  0x28   :  { %633 = vmatpush3.bf16.msra.mxu0 %v685_v0  ;;  %672 = vmatpush3.bf16.msra.mxu1 %v685_v0  ;;  %v694_v5 = vld [vmem:[#allocation3 + $0x20] sm:$0xff]   ;;  %v690_v7 = vld [vmem:[#allocation6 + $0x28] sm:$0xff]   ;;  %v691_v8 = vld [vmem:[#allocation6 + $0x30] sm:$0xff]  }
  0x29   :  { %634 = vmatprep.subr.bf16.mxu0 %v686_v1  ;;  %665 = vmatprep.subr.bf16.mxu1 %v686_v1  ;;  %v689_v6 = vld [vmem:[#allocation6 + $0x20] sm:$0xff]   ;;  %v692_v9 = vld [vmem:[#allocation6 + $0x38] sm:$0xff]   ;;  %v695_v10 = vld [vmem:[#allocation3 + $0x8] sm:$0xff]  }
  0x2a   :  { %648 = vmatprep.mubr.bf16.mxu0 %v693_v4  ;;  %656 = vmatprep.mubr.bf16.mxu1 %v694_v5  ;;  %v696_v11 = vld [vmem:[#allocation3 + $0x28] sm:$0xff]   ;;  %v697_v12 = vld [vmem:[#allocation3 + $0x10] sm:$0xff]   ;;  %v699_v14 = vld [vmem:[#allocation3 + $0x18] sm:$0xff]  }
  0x2b   :  { %v698_v13 = vld [vmem:[#allocation3 + $0x30] sm:$0xff]   ;;  %v700_v15 = vld [vmem:[#allocation3 + $0x38] sm:$0xff]   ;;  %v535_v16 = vld [vmem:[%s874_s2] ss:$0 sm:$0xff]  ;;  %s777_s2 = smov [#allocation8]  }
  0x2c   :  { %635 = vmatpush3.bf16.msra.mxu0 %v686_v1  ;;  %673 = vmatpush3.bf16.msra.mxu1 %v686_v1  ;;  %v839_v18 = vld [vmem:[%s875_s3] ss:$0 sm:$0xff]  ;;  %s506_s3 = sshll.u32 %s777_s2, 4  ;;  %s507_s3 = int_to_ptr.vmem [resolvable:$true] %s506_s3 }
  0x2d   :  { %636 = vmatprep.subr.bf16.mxu0 %v687_v2  ;;  %666 = vmatprep.subr.bf16.mxu1 %v687_v2  ;;  %s745_s17 = scalar_lea.vmem %s507_s3, 1024  ;;  %p750_p3 = scmp.lt.s32.totalorder %s507_s3, %s507_s3 }
  0x2e   :  { %p746_p2 = scmp.ne.s32.totalorder %s507_s3, %s745_s17  ;;  %p751_p4 = scmp.lt.s32.totalorder %s745_s17, %s745_s17 }
  0x30   :  { %637 = vmatpush3.bf16.msra.mxu0 %v687_v2  ;;  %674 = vmatpush3.bf16.msra.mxu1 %v687_v2  ;;  %p752_p5 = por %p751_p4, %p750_p3 }
  0x31   :  { %638 = vmatprep.subr.bf16.mxu0 %v688_v3  ;;  %667 = vmatprep.subr.bf16.mxu1 %v688_v3 }
  0x32   :  { %p753_p6 = pnand %p752_p5, %p746_p2 }
  0x34   :  { %639 = vmatpush3.bf16.msra.mxu0 %v688_v3  ;;  %675 = vmatpush3.bf16.msra.mxu1 %v688_v3 }
  0x35   :  { %640 = vmatprep.subr.bf16.mxu0 %v689_v6  ;;  %668 = vmatprep.subr.bf16.mxu1 %v689_v6 }
  0x38   :  { %641 = vmatpush3.bf16.msra.mxu0 %v689_v6  ;;  %676 = vmatpush3.bf16.msra.mxu1 %v689_v6 }
  0x39   :  { %642 = vmatprep.subr.bf16.mxu0 %v690_v7  ;;  %669 = vmatprep.subr.bf16.mxu1 %v690_v7 }
  0x3c   :  { %643 = vmatpush3.bf16.msra.mxu0 %v690_v7  ;;  %677 = vmatpush3.bf16.msra.mxu1 %v690_v7 }
  0x3d   :  { %644 = vmatprep.subr.bf16.mxu0 %v691_v8  ;;  %670 = vmatprep.subr.bf16.mxu1 %v691_v8 }
  0x40   :  { %645 = vmatpush3.bf16.msra.mxu0 %v691_v8  ;;  %678 = vmatpush3.bf16.msra.mxu1 %v691_v8 }
  0x41   :  { %646 = vmatprep.subr.bf16.mxu0 %v692_v9  ;;  %671 = vmatprep.subr.bf16.mxu1 %v692_v9 }
  0x44   :  { %647 = vmatpush3.bf16.msra.mxu0 %v692_v9  ;;  %679 = vmatpush3.bf16.msra.mxu1 %v692_v9 }
  0x47   :  { %649 = vmatmul.mubr.bf16.vlgmr.msra.gmra.mrb[0].mxu0 %v695_v10  ;;  %657 = vmatmul.mubr.bf16.vlgmr.msra.gmra.mrb[0].mxu1 %v696_v11 }
  0x48   :  { %652 = vmatprep.mubr.bf16.mxu0 %v697_v12  ;;  %660 = vmatprep.mubr.bf16.mxu1 %v698_v13 }
  0x4f   :  { %653 = vmatmul.mubr.bf16.gmra.mrb[4].mxu0 %v699_v14  ;;  %661 = vmatmul.mubr.bf16.gmra.mrb[4].mxu1 %v700_v15 }
 0x11a   :  { %v650_v17 = vpop.f32.mrb[0].mxu0  ;;  %v658_v19 = vpop.f32.mrb[0].mxu1 }
 0x11b   :  { %v368_v20 = vmul.f32 %v650_v17, %v535_v16  ;;  %v376_v21 = vmul.f32 %v658_v19, %v535_v16  ;;  %v245_v22 = vpop.f32.mrb[1].mxu0  ;;  %v277_v23 = vpop.f32.mrb[1].mxu1 }
 0x11c   :  { %v366_v24 = vmul.f32 %v535_v16, %v245_v22  ;;  %v374_v25 = vmul.f32 %v535_v16, %v277_v23  ;;  %v651_v26 = vpop.f32.mrb[2].mxu0  ;;  %v659_v27 = vpop.f32.mrb[2].mxu1 }
 0x11d   :  { %v391_v28 = vadd.f32 %v839_v18, %v368_v20  ;;  %v399_v29 = vadd.f32 %v839_v18, %v376_v21  ;;  %v369_v30 = vmul.f32 %v651_v26, %v535_v16  ;;  %v377_v31 = vmul.f32 %v659_v27, %v535_v16  ;;  %v248_v32 = vpop.f32.mrb[3].mxu0  ;;  %v280_v33 = vpop.f32.mrb[3].mxu1 }
 0x11e   :  { %v389_v34 = vadd.f32 %v839_v18, %v366_v24  ;;  %v397_v35 = vadd.f32 %v839_v18, %v374_v25  ;;  %v367_v36 = vmul.f32 %v535_v16, %v248_v32  ;;  %v375_v37 = vmul.f32 %v535_v16, %v280_v33 }
 0x11f   :  { %v392_v38 = vadd.f32 %v839_v18, %v369_v30  ;;  %v400_v39 = vadd.f32 %v839_v18, %v377_v31  ;;  %v407_v42 = vmax.f32 %v391_v28, 0.0  ;;  %v415_v43 = vmax.f32 %v399_v29, 0.0 }
 0x120   :  { %v390_v40 = vadd.f32 %v839_v18, %v367_v36  ;;  %v398_v41 = vadd.f32 %v839_v18, %v375_v37  ;;  %v405_v46 = vmax.f32 %v389_v34, 0.0  ;;  %v413_v47 = vmax.f32 %v397_v35, 0.0 }
 0x121   :  { %v408_v44 = vmax.f32 %v392_v38, 0.0  ;;  %v416_v45 = vmax.f32 %v400_v39, 0.0 }
 0x122   :  { %v406_v48 = vmax.f32 %v390_v40, 0.0  ;;  %v414_v49 = vmax.f32 %v398_v41, 0.0  ;;  %v654_v50 = vpop.f32.mrb[4].mxu0  ;;  %v662_v51 = vpop.f32.mrb[4].mxu1 }
 0x123   :  { %v577_v52 = vpack.c.bf16 %v408_v44, %v407_v42  ;;  %v597_v53 = vpack.c.bf16 %v416_v45, %v415_v43  ;;  %v372_v54 = vmul.f32 %v654_v50, %v535_v16  ;;  %v380_v55 = vmul.f32 %v662_v51, %v535_v16  ;;  %v261_v56 = vpop.f32.mrb[5].mxu0  ;;  %v293_v57 = vpop.f32.mrb[5].mxu1 }
 0x124   :  { %v572_v58 = vpack.c.bf16 %v406_v48, %v405_v46  ;;  %v592_v59 = vpack.c.bf16 %v414_v49, %v413_v47  ;;  %v370_v60 = vmul.f32 %v535_v16, %v261_v56  ;;  %v378_v61 = vmul.f32 %v535_v16, %v293_v57  ;;  %v655_v62 = vpop.f32.mrb[6].mxu0  ;;  %v663_v63 = vpop.f32.mrb[6].mxu1 }
 0x125   :  { %609 = vst [vmem:[#allocation8 + $0x8] sm:$0xff] %v577_v52   ;;  %613 = vst [vmem:[#allocation8 + $0x28] sm:$0xff] %v597_v53   ;;  %v395_v0 = vadd.f32 %v839_v18, %v372_v54  ;;  %v403_v1 = vadd.f32 %v839_v18, %v380_v55  ;;  %v373_v2 = vmul.f32 %v655_v62, %v535_v16  ;;  %v264_v4 = vpop.f32.mrb[7].mxu0  ;;  %v296_v5 = vpop.f32.mrb[7].mxu1 }
 0x126   :  { %v381_v3 = vmul.f32 %v663_v63, %v535_v16  ;;  %573 = vst [vmem:[#allocation8] sm:$0xff] %v572_v58   ;;  %612 = vst [vmem:[#allocation8 + $0x20] sm:$0xff] %v592_v59   ;;  %v393_v6 = vadd.f32 %v839_v18, %v370_v60  ;;  %v401_v7 = vadd.f32 %v839_v18, %v378_v61 }
 0x127   :  { %v371_v8 = vmul.f32 %v535_v16, %v264_v4  ;;  %v379_v9 = vmul.f32 %v535_v16, %v296_v5  ;;  %v396_v10 = vadd.f32 %v839_v18, %v373_v2  ;;  %v411_v14 = vmax.f32 %v395_v0, 0.0 }
 0x128   :  { %v404_v11 = vadd.f32 %v839_v18, %v381_v3  ;;  %v419_v15 = vmax.f32 %v403_v1, 0.0  ;;  %v409_v20 = vmax.f32 %v393_v6, 0.0  ;;  %v417_v21 = vmax.f32 %v401_v7, 0.0 }
 0x129   :  { %v394_v12 = vadd.f32 %v839_v18, %v371_v8  ;;  %v402_v13 = vadd.f32 %v839_v18, %v379_v9  ;;  %v412_v17 = vmax.f32 %v396_v10, 0.0 }
 0x12a   :  { %v420_v19 = vmax.f32 %v404_v11, 0.0 }
 0x12b   :  { %v410_v22 = vmax.f32 %v394_v12, 0.0  ;;  %v418_v23 = vmax.f32 %v402_v13, 0.0  ;;  %v587_v24 = vpack.c.bf16 %v412_v17, %v411_v14 }
 0x12c   :  { %v607_v16 = vpack.c.bf16 %v420_v19, %v419_v15 }
 0x12d   :  { %v582_v25 = vpack.c.bf16 %v410_v22, %v409_v20  ;;  %v602_v26 = vpack.c.bf16 %v418_v23, %v417_v21  ;;  %611 = vst [vmem:[#allocation8 + $0x18] sm:$0xff] %v587_v24  }
 0x12e   :  { %615 = vst [vmem:[#allocation8 + $0x38] sm:$0xff] %v607_v16  }
 0x12f   :  { %610 = vst [vmem:[#allocation8 + $0x10] sm:$0xff] %v582_v25   ;;  %614 = vst [vmem:[#allocation8 + $0x30] sm:$0xff] %v602_v26  }
 0x130   :  { %756 = shalt.err (!%p753_p6)
}
 0x131   :  { %s757_s20 = scalar_lea.hbm %s876_s4, 1024 }
 0x132   :  { %p758_p7 = scmp.ne.s32.totalorder %s876_s4, %s757_s20  ;;  %p761_p8 = scmp.lt.u32.totalorder %s757_s20, %s876_s4 }
 0x134   :  { %p763_p9 = pnand %p761_p8, %p758_p7 }
 0x136   :  { %766 = shalt.err (!%p763_p9)
}
 0x137   :  { %512 = dma.vmem_to_hbm [thread:$0]  %s507_s3, 1024, %s876_s4, [#allocation5], %s774_s25, %s774_s25, %s775_s26  }
 0x138   :  { %771 = dma.done.wait [#allocation5], 1024  }
 0x139   :  { %772 = vsyncadd [#allocation5], 4294966272 }
 0x13a   :  { %516 = vsyncpa [#allocation4], 1 }
 0x13b   :  { %517 = vsyncpa [#allocation7], 1 }
 0x13c   :  { %518 = vsyncpa [#allocation5], 1 }

</bundles_post_ra>
